<compile_context>
chip_gen: v5e
topology: v5e:2x2
jax: 0.10.0
libtpu: 0.0.40
codegen_flags: <defaults>
</compile_context>

<pallas_src>
import functools

import jax
import jax.numpy as jnp
from jax.experimental import pallas as pl
from jax.experimental.pallas import tpu as pltpu


def _choose_pack(L, d_mark, n_per, max_lanes=512):
    """Largest pack that divides L (so packed reshapes are metadata-only),
    preferring lane-dense output (pack*n_per % 128 == 0), then lane-dense
    input (pack*d_mark % 128 == 0).  Falls back to pack=1 (correct, but hits
    the masked sub-128-lane store slow path) when no divisor works."""
    best, best_key = 1, (False, False, 1)
    for p in range(1, max(1, max_lanes // n_per) + 1):
        if L % p:
            continue
        key = ((p * n_per) % 128 == 0, (p * d_mark) % 128 == 0, p)
        if key > best_key:
            best, best_key = p, key
    return best


def _t2v_packed_kernel(tau_ref, w_ref, b_ref, o_ref, acc_ref, *, n_per):
    # tau_ref: (tm, pack*d_mark)           packed input rows
    # w_ref:   (pack*d_mark, pack*n_per)   block-diagonal kron(I_pack, [w0|w])
    # b_ref:   (1, pack*n_per)             tiled fused [b0 | b]
    # o_ref:   (tm, pack*n_per)            lane-dense packed output (one d_features slab)
    # acc_ref: (tm, pack*n_per) f32        scratch, computed once per (batch, row-tile)
    @pl.when(pl.program_id(2) == 0)
    def _compute():
        # f32 MXU matmul; for strict torch-fp32 bit parity one could add
        # precision=HIGHEST (negligible cost at K<=128).  Bias stays on the
        # VPU (1 of ~20 ops/elem); fold into the MXU (ones column) only if a
        # v7x bundle dump shows the VALU slot saturating.
        z = jnp.dot(tau_ref[...], w_ref[...],
                    preferred_element_type=jnp.float32) + b_ref[...]
        # lane c holds output feature (c % n_per); feature 0 = trend (identity),
        # features 1.. = periodic (sin).
        col = jax.lax.broadcasted_iota(jnp.int32, (1, z.shape[-1]), 1)
        acc_ref[...] = jnp.where(col % n_per == 0, z, jnp.sin(z))

    # Store the same computed tile to every d_features slab (fused repeat).
    o_ref[...] = acc_ref[...].astype(o_ref.dtype)


@functools.partial(jax.jit, static_argnames=("d_features", "block_rows", "out_dtype"))
def sine_activation_forward(tau, w0, b0, w, b, *, d_features,
                            block_rows=1024, out_dtype=jnp.float32):
    """
    tau: (B, d_mark, L) float32
    w0:  (d_mark, 1), b0: (1,), w: (d_mark, out-1), b: (out-1,)
    returns (B, d_features, L, out_features) in out_dtype (f32 matches module).
    """
    tau = tau.astype(jnp.float32)
    B, d_mark, L = tau.shape
    n_per = 1 + w.shape[1]                      # out_features

    pack = _choose_pack(L, d_mark, n_per)       # packed rows per 512-lane slab
    lanes = pack * n_per                        # output lanes per packed row
    kdim = pack * d_mark                        # packed contraction dim
    Lp = L // pack                              # packed rows per batch

    # ---- tile size: as large as a conservative VMEM budget allows (v5e-safe:
    #      2x-buffered in + 2x-buffered out + scratch must stay well under the
    #      16 MiB default scoped VMEM).
    block_rows = max(8, (block_rows // 8) * 8)
    bytes_per_row = 4 * (2 * kdim + 3 * lanes)
    tm_cap = max(8, ((12 * 1024 * 1024) // bytes_per_row) // 8 * 8)
    tm = Lp if Lp <= min(block_rows, tm_cap) else min(block_rows, tm_cap)
    num_row_tiles = pl.cdiv(Lp, tm)             # ragged tail handled by Pallas

    # ---- operand prep (the transpose is the only potential copy; XLA may fuse
    #      it into the Pallas input DMA via allow_input_fusion; the packed
    #      reshape after it is metadata-only, and no pad is needed).
    tau_packed = jnp.transpose(tau, (0, 2, 1)).reshape(B, Lp, kdim)
    W_full = jnp.concatenate([w0, w], axis=-1).astype(jnp.float32)    # (d_mark, n_per)
    bias = jnp.concatenate([b0, b], axis=0).astype(jnp.float32)       # (n_per,)
    W_packed = jnp.kron(jnp.eye(pack, dtype=jnp.float32), W_full)     # (kdim, lanes)
    b_packed = jnp.tile(bias, pack).reshape(1, lanes)                 # (1, lanes)

    grid = (B, num_row_tiles, d_features)
    out_packed = pl.pallas_call(
        functools.partial(_t2v_packed_kernel, n_per=n_per),
        out_shape=jax.ShapeDtypeStruct((B, d_features, Lp, lanes), out_dtype),
        grid_spec=pltpu.PrefetchScalarGridSpec(
            num_scalar_prefetch=0,
            grid=grid,
            in_specs=[
                pl.BlockSpec((None, tm, kdim), lambda bb, ii, ff: (bb, ii, 0)),
                pl.BlockSpec((kdim, lanes), lambda bb, ii, ff: (0, 0)),
                pl.BlockSpec((1, lanes), lambda bb, ii, ff: (0, 0)),
            ],
            out_specs=pl.BlockSpec((None, None, tm, lanes),
                                   lambda bb, ii, ff: (bb, ff, ii, 0)),
            scratch_shapes=[pltpu.VMEM((tm, lanes), jnp.float32)],
        ),
        compiler_params=pltpu.CompilerParams(
            # batch / row-tile axes shard across v7x's 2 TCs; d_features must be
            # sequential (innermost) so the df==0 compute precedes the copies.
            dimension_semantics=("parallel", "parallel", "arbitrary"),
            allow_input_fusion=[True, False, False],
        ),
    )(tau_packed, W_packed, b_packed)

    # (B, d_features, Lp, pack*n_per) -> (B, d_features, L, n_per): free reshape.
    return out_packed.reshape(B, d_features, L, n_per)


def _reference(tau, w0, b0, w, b, d_features):
    tau_t = jnp.swapaxes(tau, -1, -2)
    v1 = jnp.sin(jnp.matmul(tau_t, w) + b)
    v2 = jnp.matmul(tau_t, w0) + b0
    out = jnp.concatenate([v2, v1], axis=-1)
    return jnp.broadcast_to(out[:, None, :, :],
                            (out.shape[0], d_features, out.shape[1], out.shape[2]))


if __name__ == "__main__":
    # Small shapes consistent with the module.
    B = 2          # batch
    d_mark = 4     # time-mark features (input channels of tau)
    L = 8          # sequence length
    out_features = 16
    d_features = 3

    key = jax.random.PRNGKey(0)
    k_tau, k_w0, k_b0, k_w, k_b, k_data, k_tau2 = jax.random.split(key, 7)

    # Deterministic parameter init: uniform(-1, 1), matching nn.init.uniform_.
    w0 = jax.random.uniform(k_w0, (d_mark, 1), jnp.float32, -1.0, 1.0)
    b0 = jax.random.uniform(k_b0, (1,), jnp.float32, -1.0, 1.0)
    w = jax.random.uniform(k_w, (d_mark, out_features - 1), jnp.float32, -1.0, 1.0)
    b = jax.random.uniform(k_b, (out_features - 1,), jnp.float32, -1.0, 1.0)

    tau = jax.random.normal(k_tau, (B, d_mark, L), jnp.float32)
    data = jax.random.normal(k_data, (B, d_mark, L), jnp.float32)  # unused by forward

    out = sine_activation_forward(tau, w0, b0, w, b, d_features=d_features)
    out = jax.block_until_ready(out)
    ref = _reference(tau, w0, b0, w, b, d_features)
    assert out.shape == (B, d_features, L, out_features), out.shape
    assert jnp.allclose(out, ref, atol=1e-5, rtol=1e-5), "mismatch vs reference (small)"

    # Second check: longer sequence with a tiny block_rows to exercise the
    # multi-tile path and Pallas' ragged last row-tile handling.
    L2 = 360
    tau2 = jax.random.normal(k_tau2, (B, d_mark, L2), jnp.float32)
    out2 = jax.block_until_ready(
        sine_activation_forward(tau2, w0, b0, w, b, d_features=d_features, block_rows=8))
    ref2 = _reference(tau2, w0, b0, w, b, d_features)
    assert out2.shape == (B, d_features, L2, out_features), out2.shape
    assert jnp.allclose(out2, ref2, atol=1e-5, rtol=1e-5), "mismatch vs reference (ragged)"

    print("KERNEL_OK")
</pallas_src>

<mosaic_0001>
module attributes {stable_mosaic.version = 11 : i64} {
  func.func @_t2v_packed_kernel(%arg0: i32, %arg1: i32, %arg2: i32, %arg3: memref<1x1x32xf32, #tpu.memory_space<vmem>>, %arg4: memref<32x128xf32, #tpu.memory_space<vmem>>, %arg5: memref<1x128xf32, #tpu.memory_space<vmem>>, %arg6: memref<1x1x1x128xf32, #tpu.memory_space<vmem>>, %arg7: memref<1x128xf32, #tpu.memory_space<vmem>>) attributes {dimension_semantics = [#tpu.dimension_semantics<parallel>, #tpu.dimension_semantics<parallel>, #tpu.dimension_semantics<arbitrary>], iteration_bounds = array<i64: 2, 1, 3>, scalar_prefetch = 0 : i64, scratch_operands = 1 : i64, tpu.core_type = #tpu.core_type<tc>, window_params = [{transform_indices = @transform_0, window_bounds = array<i64: 1, 1, 32>}, {pipeline_mode = #tpu.pipeline_mode<synchronous>, transform_indices = @transform_1, window_bounds = array<i64: 32, 128>}, {pipeline_mode = #tpu.pipeline_mode<synchronous>, transform_indices = @transform_2, window_bounds = array<i64: 1, 128>}, {transform_indices = @transform_3, window_bounds = array<i64: 1, 1, 1, 128>}]} {
    %c0_i32 = arith.constant 0 : i32
    %0 = arith.cmpi eq, %arg2, %c0_i32 : i32
    %1 = arith.extui %0 : i1 to i32
    %c0_i32_0 = arith.constant 0 : i32
    %2 = arith.cmpi ne, %1, %c0_i32_0 : i32
    scf.if %2 {
      %c0_6 = arith.constant 0 : index
      %c0_7 = arith.constant 0 : index
      %c0_8 = arith.constant 0 : index
      %7 = vector.load %arg3[%c0_6, %c0_7, %c0_8] : memref<1x1x32xf32, #tpu.memory_space<vmem>>, vector<1x1x32xf32>
      %8 = vector.shape_cast %7 : vector<1x1x32xf32> to vector<1x32xf32>
      %c0_9 = arith.constant 0 : index
      %c0_10 = arith.constant 0 : index
      %9 = vector.load %arg4[%c0_9, %c0_10] : memref<32x128xf32, #tpu.memory_space<vmem>>, vector<32x128xf32>
      %cst = arith.constant dense<0.000000e+00> : vector<1x128xf32>
      %10 = tpu.matmul %8, %9, %cst {dimension_numbers = #tpu.dot_dimension_numbers<[1], [0], [0], [1], [0, 0, 1, 1], [], []>} : vector<1x32xf32>, vector<32x128xf32>, vector<1x128xf32> -> vector<1x128xf32>
      %c0_11 = arith.constant 0 : index
      %c0_12 = arith.constant 0 : index
      %11 = vector.load %arg5[%c0_11, %c0_12] : memref<1x128xf32, #tpu.memory_space<vmem>>, vector<1x128xf32>
      %12 = arith.addf %10, %11 : vector<1x128xf32>
      %13 = tpu.iota {dimensions = array<i32: 1>} : vector<1x128xi32>
      %c16_i32 = arith.constant 16 : i32
      %c0_i32_13 = arith.constant 0 : i32
      %14 = arith.cmpi eq, %c16_i32, %c0_i32_13 : i32
      %c1_i32 = arith.constant 1 : i32
      %15 = arith.select %14, %c1_i32, %c16_i32 : i32
      %16 = vector.broadcast %15 : i32 to vector<1x128xi32>
      %17 = arith.remsi %13, %16 : vector<1x128xi32>
      %c0_i32_14 = arith.constant 0 : i32
      %18 = vector.broadcast %c0_i32_14 : i32 to vector<1x128xi32>
      %19 = arith.cmpi ne, %17, %18 : vector<1x128xi32>
      %c0_i32_15 = arith.constant 0 : i32
      %20 = vector.broadcast %c0_i32_15 : i32 to vector<1x128xi32>
      %21 = arith.cmpi slt, %17, %20 : vector<1x128xi32>
      %c0_i32_16 = arith.constant 0 : i32
      %22 = arith.cmpi slt, %15, %c0_i32_16 : i32
      %23 = vector.broadcast %22 : i1 to vector<1x128xi1>
      %24 = vector.broadcast %23 : vector<1x128xi1> to vector<1x128xi1>
      %25 = arith.xori %21, %24 : vector<1x128xi1>
      %26 = arith.andi %25, %19 : vector<1x128xi1>
      %27 = vector.broadcast %15 : i32 to vector<1x128xi32>
      %28 = arith.addi %17, %27 : vector<1x128xi32>
      %29 = arith.select %26, %28, %17 : vector<1x128xi1>, vector<1x128xi32>
      %c0_i32_17 = arith.constant 0 : i32
      %30 = vector.broadcast %c0_i32_17 : i32 to vector<1x128xi32>
      %31 = arith.cmpi eq, %29, %30 : vector<1x128xi32>
      %32 = math.sin %12 : vector<1x128xf32>
      %33 = arith.select %31, %12, %32 : vector<1x128xi1>, vector<1x128xf32>
      %c0_18 = arith.constant 0 : index
      %c0_19 = arith.constant 0 : index
      %34 = vector.load %arg7[%c0_18, %c0_19] : memref<1x128xf32, #tpu.memory_space<vmem>>, vector<1x128xf32>
      tpu.vector_store %arg7[%c0_18, %c0_19], %33 {strides = array<i32>} : memref<1x128xf32, #tpu.memory_space<vmem>>, vector<1x128xf32>,
    } else {
    }
    %c0 = arith.constant 0 : index
    %c0_1 = arith.constant 0 : index
    %3 = vector.load %arg7[%c0, %c0_1] : memref<1x128xf32, #tpu.memory_space<vmem>>, vector<1x128xf32>
    %c0_2 = arith.constant 0 : index
    %c0_3 = arith.constant 0 : index
    %c0_4 = arith.constant 0 : index
    %c0_5 = arith.constant 0 : index
    %4 = vector.load %arg6[%c0_2, %c0_3, %c0_4, %c0_5] : memref<1x1x1x128xf32, #tpu.memory_space<vmem>>, vector<1x1x1x128xf32>
    %5 = vector.shape_cast %4 : vector<1x1x1x128xf32> to vector<1x128xf32>
    %6 = vector.shape_cast %3 : vector<1x128xf32> to vector<1x1x1x128xf32>
    tpu.vector_store %arg6[%c0_2, %c0_3, %c0_4, %c0_5], %6 {strides = array<i32>} : memref<1x1x1x128xf32, #tpu.memory_space<vmem>>, vector<1x1x1x128xf32>,
    return
  }
  func.func @transform_0(%arg0: i32, %arg1: i32, %arg2: i32) -> (i32, i32, i32) {
    %c0_i32 = arith.constant 0 : i32
    %c0_i32_0 = arith.constant 0 : i32
    return %arg0, %arg1, %c0_i32 : i32, i32, i32
  }
  func.func @transform_1(%arg0: i32, %arg1: i32, %arg2: i32) -> (i32, i32) {
    %c0_i32 = arith.constant 0 : i32
    %c0_i32_0 = arith.constant 0 : i32
    %c0_i32_1 = arith.constant 0 : i32
    return %c0_i32, %c0_i32_0 : i32, i32
  }
  func.func @transform_2(%arg0: i32, %arg1: i32, %arg2: i32) -> (i32, i32) {
    %c0_i32 = arith.constant 0 : i32
    %c0_i32_0 = arith.constant 0 : i32
    %c0_i32_1 = arith.constant 0 : i32
    return %c0_i32, %c0_i32_0 : i32, i32
  }
  func.func @transform_3(%arg0: i32, %arg1: i32, %arg2: i32) -> (i32, i32, i32, i32) {
    %c0_i32 = arith.constant 0 : i32
    %c0_i32_0 = arith.constant 0 : i32
    return %arg0, %arg2, %arg1, %c0_i32 : i32, i32, i32, i32
  }
}

</mosaic_0001>

<bundles_post_ra>
// kernel: tile.8
= control target key start
LH: loop header
LB: loop body
LE: loop exit
PB: predicated region body
PF: predicated region fallthrough
CT: control target
= control target key end

     0   :  { %s22_s0 = inlined_call_operand.vmem [shape: f32[16], index: 0, kind: input, shape index: {}]   ;;  %s23_s1 = inlined_call_operand.vmem [shape: f32[8,16], index: 1, kind: output, shape index: {}]  }
   0x1   :  { %v4_v0 = vld [vmem:[%s22_s0] ss:$0 sm:$0xff] }
   0x2   :  { %5 = vst [vmem:[%s23_s1] sm:$0xff] %v4_v0 }

// kernel: tile.9
= control target key start
LH: loop header
LB: loop body
LE: loop exit
PB: predicated region body
PF: predicated region fallthrough
CT: control target
= control target key end

     0   :  { %s67_s10 = smov 112   ;;  %s68_s11 = smov 80   ;;  %vm3_vm0 = vcmask 130048   ;;  %vm9_vm1 = vcmask 1048448   ;;  %vm15_vm2 = vcmask 917248   ;;  %vm21_vm3 = vcmask 786048   ;;  %s111_s0 = inlined_call_operand.vmem [shape: f32[8,16], index: 0, kind: input, shape index: {}]   ;;  %s112_s1 = inlined_call_operand.vmem [shape: f32[1,128], index: 1, kind: output, shape index: {}]  }
   0x1   :  { %v53_v0 = vld [vmem:[%s111_s0 + $0x7] sm:$0x1]   ;;  %v55_v1 = vld [vmem:[%s111_s0 + $0x5] sm:$0x1]   ;;  %v57_v2 = vld [vmem:[%s111_s0 + $0x3] sm:$0x1]  }
   0x2   :  { %7 = vrot.lane.b32.xlu0 %v53_v0, %s67_s10  ;;  %19 = vrot.lane.b32.xlu1 %v55_v1, %s68_s11  ;;  %s69_s14 = smov 48   ;;  %v54_v3 = vld [vmem:[%s111_s0 + $0x6] sm:$0x1]   ;;  %v56_v4 = vld [vmem:[%s111_s0 + $0x4] sm:$0x1]   ;;  %s70_s21 = smov 96  }
   0x3   :  { %31 = vrot.lane.b32.xlu2 %v57_v2, %s69_s14  ;;  %v58_v5 = vld [vmem:[%s111_s0 + $0x2] sm:$0x1]   ;;  %s71_s22 = smov 64   ;;  %s72_s23 = smov 32   ;;  %v59_v6 = vld [vmem:[%s111_s0 + $0x1] sm:$0x1]  }
   0x4   :  { %s73_s26 = smov 16   ;;  %v2_v7 = vld [vmem:[%s111_s0] sm:$0x1]   ;;  %vm27_vm4 = vcmask 654848   ;;  %vm33_vm5 = vcmask 523648   ;;  %vm39_vm6 = vcmask 392448  }
   0x5   :  { %4 = vst.msk [vmem:[#allocation0] sm:$0x1] %vm3_vm0, %v2_v7   ;;  %vm45_vm7 = vcmask 261248  }
   0xa   :  { %13 = vrot.lane.b32.xlu0 %v54_v3, %s70_s21  ;;  %25 = vrot.lane.b32.xlu1 %v56_v4, %s71_s22 }
   0xb   :  { %37 = vrot.lane.b32.xlu2 %v58_v5, %s72_s23 }
  0x12   :  { %43 = vrot.lane.b32.xlu0 %v59_v6, %s73_s26 }
  0x5d   :  { %v32_v8 = vpop.permute.xlu2 %31  }
  0x65   :  { %v38_v9 = vpop.permute.xlu2 %37  }
  0x74   :  { %v8_v10 = vpop.permute.xlu0 %7   ;;  %v20_v11 = vpop.permute.xlu1 %19  }
  0x75   :  { %10 = vst.msk [vmem:[#allocation0] sm:$0x1] %vm9_vm1, %v8_v10  }
  0x7c   :  { %v14_v12 = vpop.permute.xlu0 %13   ;;  %v26_v13 = vpop.permute.xlu1 %25  }
  0x7d   :  { %16 = vst.msk [vmem:[#allocation0] sm:$0x1] %vm15_vm2, %v14_v12  }
  0x7e   :  { %22 = vst.msk [vmem:[#allocation0] sm:$0x1] %vm21_vm3, %v20_v11  }
  0x7f   :  { %28 = vst.msk [vmem:[#allocation0] sm:$0x1] %vm27_vm4, %v26_v13  }
  0x80   :  { %34 = vst.msk [vmem:[#allocation0] sm:$0x1] %vm33_vm5, %v32_v8  }
  0x81   :  { %40 = vst.msk [vmem:[#allocation0] sm:$0x1] %vm39_vm6, %v38_v9  }
  0x84   :  { %v44_v14 = vpop.permute.xlu0 %43  }
  0x85   :  { %46 = vst.msk [vmem:[#allocation0] sm:$0x1] %vm45_vm7, %v44_v14  }
  0x8c   :  { %v49_v15 = vld [vmem:[#allocation0] sm:$0x1] }
  0x8d   :  { %52 = vst [vmem:[%s112_s1] sm:$0x1] %v49_v15 }

// kernel: sine_activation_forward.1
= control target key start
LH: loop header
LB: loop body
LE: loop exit
PB: predicated region body
PF: predicated region fallthrough
CT: control target
= control target key end

     0   :  { %s631_s12 = smov 0   ;;  %s633_s13 = smov 0   ;;  %s770_s0 = inlined_call_operand.vmem [shape: f32[2,1,32], index: 0, kind: input, shape index: {}]   ;;  %s771_s1 = inlined_call_operand.vmem [shape: f32[32,128], index: 1, kind: input, shape index: {}]   ;;  %s772_s2 = inlined_call_operand.vmem [shape: f32[1,128], index: 2, kind: input, shape index: {}]   ;;  %s773_s3 = inlined_call_operand.vmem [shape: f32[2,3,1,128], index: 3, kind: output, shape index: {}]  }
   0x1   :  { %s635_s14 = smov 0   ;;  %s637_s15 = smov 0  }
   0x2   :  { %s639_s16 = smov 0  }
   0x3 LB: > { %s25_s17 = sadd.s32 1, %s594_s14  ;;  %s32_s18 = sadd.s32 1, %s598_s15  ;;  %s602_s16 = sphi %s639_s16, %s13_s16   ;;  %s598_s15 = sphi %s637_s15, %s779_s15   ;;  %s594_s14 = sphi %s635_s14, %s778_s14   ;;  %s590_s13 = sphi %s633_s13, %s777_s13   ;;  %s586_s12 = sphi %s631_s12, %s776_s12  }
   0x4   : > { %p26_p0 = scmp.ge.s32.totalorder %s25_s17, 3  ;;  %p508_p1 = scmp.ge.s32.totalorder %s602_s16, 1 }
   0x5   : > { %p163_p2 = scmp.lt.s32.totalorder %s602_s16, 7 }
   0x6   : > { %s781_s17 = smov (%p26_p0, %s25_s17), 0  ;;  %s783_s18 = smov (!%p26_p0, %s32_s18), %s598_s15 }
   0x7   : > { %p164_p3 = pnand %p508_p1, %p163_p2  ;;  %p34_p4 = scmp.ge.s32.totalorder %s783_s18, 2 }
   0x8   : > { %p193_p5 = scmp.lt.s32.totalorder (!%p164_p3), %s590_s13, 1  ;;  %p201_p6 = scmp.lt.s32.totalorder (!%p164_p3), %s586_s12, 2 }
   0x9   : > { %s785_s18 = smov (%p34_p4, %s783_s18), 0  ;;  %167 = sbr.rel (%p164_p3) target bundleno = 264 (0x108), region = 32 }
   0xa   : > { %p509_p7 = scmp.ne.s32.totalorder (!%p164_p3), %s586_s12, 0 }
   0xe   : > { %s787_s13 = smov (!%p193_p5, %s590_s13), 1 }
   0xf   : > { %s202_s19 = scalar_select %p201_p6, %s586_s12, 2 }
  0x10   : > { %s198_s22 = scalar_lea.vmem %s770_s0, %s787_s13  ;;  %s516_s23 = smul.u32 3, %s787_s13 }
  0x11   : > { %212 = sbr.rel (%p509_p7) target bundleno = 256 (0x100), region = 36 }
  0x12   : > { %s664_s24 = sadd.s32 %s516_s23, %s202_s19 }
  0x13   : > { %s208_s27 = scalar_lea.vmem %s773_s3, %s664_s24 }
  0x16   : > { %v217_v0 = vld [vmem:[%s771_s1 + $0x18] sm:$0xff]  ;;  %v216_v1 = vld [vmem:[%s771_s1 + $0x10] sm:$0xff]  ;;  %v215_v2 = vld [vmem:[%s771_s1 + $0x8] sm:$0xff]  ;;  %vm219_vm0 = vcmask 261120   ;;  %v604_v19 = vmov 683565275  }
  0x17   : > { %235 = vmatpush.msra.mxu0 %v217_v0  ;;  %v214_v3 = vld [vmem:[%s771_s1] sm:$0xff]  ;;  %v605_v21 = vmov 2475754826   ;;  %v606_v24 = vmov 2131351028  }
  0x18   : > { %v213_v4 = vld [vmem:[%s198_s22] sm:$0x1]  ;;  %v607_v27 = vmov 2102212464   ;;  %v608_v30 = vmov 920167782  }
  0x19   : > { %236 = vmatpush.msra.mxu0 %v216_v1  ;;  %v218_v5 = vld [vmem:[%s772_s2] sm:$0x1]  ;;  %v609_v33 = vmov 1326507024  }
  0x1b   : > { %237 = vmatpush.msra.mxu0 %v215_v2 }
  0x1d   : > { %238 = vmatpush.msra.mxu0 %v214_v3  ;;  %v610_v3 = vmov 0  }
  0x1e   : > { %510 = vmatmul.msk.f32.vlgmr.msra.gmra.mxu0 %vm219_vm0, %v213_v4 }
  0x9b   : > { %v240_v6 = vpop.f32.mrf.mxu0 }
  0x9c   : > { %v685_v7 = vadd.f32 %v240_v6, %v218_v5 }
  0x9e   : > { %v261_v8 = vand.u32 2139095040, %v685_v7  ;;  %v258_v11 = vand.u32 2147483647, %v685_v7  ;;  %vm260_vm13 = vcmp.lt.s32.totalorder %v685_v7, 0 }
  0xa0   : > { %v262_v9 = vshrl.u32 %v261_v8, 23  ;;  %v265_v13 = vand.u32 8388607, %v258_v11  ;;  %vm739_vm14 = vcmp.le.f32.partialorder %v258_v11, 0.7853982 }
  0xa2   : > { %v511_v10 = vadd.s32 4294967169, %v262_v9  ;;  %v266_v17 = vor.u32 8388608, %v265_v13 }
  0xa4   : > { %v268_v12 = vadd.s32 1, %v511_v10  ;;  %v702_v40 = vshll.u32 %v266_v17, 8 }
  0xa6   : > { %vm269_vm1 = vcmp.gt.s32.totalorder %v268_v12, 0  ;;  %v307_v49 = vand.u32 65535, %v702_v40  ;;  %v308_v50 = vshrl.u32 %v702_v40, 16 }
  0xa7   : > { %v270_v14 = vsel %vm269_vm1, %v268_v12, 0 }
  0xa8   : > { %v272_v15 = vand.u32 31, %v270_v14  ;;  %v693_v18 = vshrl.u32 %v270_v14, 5 }
  0xaa   : > { %v691_v16 = vsub.s32 32, %v272_v15  ;;  %v275_v20 = vshll.u32 %v604_v19, %v272_v15  ;;  %v278_v22 = vshll.u32 %v605_v21, %v272_v15  ;;  %v281_v26 = vshll.u32 %v606_v24, %v272_v15 }
  0xab   : > { %v284_v29 = vshll.u32 %v607_v27, %v272_v15  ;;  %v287_v32 = vshll.u32 %v608_v30, %v272_v15  ;;  %vm290_vm2 = vcmp.lt.s32.totalorder %v693_v18, 1  ;;  %vm293_vm3 = vcmp.lt.s32.totalorder %v693_v18, 4 }
  0xac   : > { %v276_v23 = vshrl.u32 %v605_v21, %v691_v16  ;;  %v279_v25 = vshrl.u32 %v606_v24, %v691_v16  ;;  %v282_v28 = vshrl.u32 %v607_v27, %v691_v16  ;;  %v285_v31 = vshrl.u32 %v608_v30, %v691_v16 }
  0xad   : > { %v288_v34 = vshrl.u32 %v609_v33, %v691_v16  ;;  %vm292_vm4 = vcmp.lt.s32.totalorder %v693_v18, 3  ;;  %vm291_vm5 = vcmp.lt.s32.totalorder %v693_v18, 2  ;;  %v274_v14 = vshrl.u32 %v604_v19, %v691_v16 }
  0xae   : > { %v277_v35 = vor.u32 %v276_v23, %v275_v20  ;;  %v280_v36 = vor.u32 %v279_v25, %v278_v22  ;;  %v283_v37 = vor.u32 %v282_v28, %v281_v26  ;;  %v286_v38 = vor.u32 %v285_v31, %v284_v29 }
  0xaf   : > { %v289_v39 = vor.u32 %v288_v34, %v287_v32 }
  0xb0   : > { %v298_v41 = vsel %vm290_vm2, %v277_v35, %v280_v36  ;;  %v302_v42 = vsel %vm290_vm2, %v280_v36, %v283_v37  ;;  %v299_v43 = vsel %vm293_vm3, %v286_v38, 920167782  ;;  %v295_v10 = vsel %vm293_vm3, %v283_v37, 2102212464 }
  0xb1   : > { %v303_v44 = vsel %vm293_vm3, %v289_v39, 1326507024  ;;  %v300_v45 = vsel %vm292_vm4, %v283_v37, %v299_v43  ;;  %v294_v23 = vsel %vm290_vm2, %v274_v14, %v277_v35  ;;  %v296_v24 = vsel %vm292_vm4, %v280_v36, %v295_v10 }
  0xb2   : > { %v304_v46 = vsel %vm292_vm4, %v286_v38, %v303_v44  ;;  %v301_v47 = vsel %vm291_vm5, %v298_v41, %v300_v45  ;;  %v297_v16 = vsel %vm291_vm5, %v294_v23, %v296_v24  ;;  %vm401_vm3 = vweird.f32 %v685_v7 }
  0xb3   : > { %v305_v48 = vsel %vm291_vm5, %v302_v42, %v304_v46  ;;  %v331_v53 = vand.u32 65535, %v301_v47  ;;  %v332_v54 = vshrl.u32 %v301_v47, 16  ;;  %v351_v32 = vmul.u32 %v702_v40, %v297_v16 }
  0xb4   : > { %v309_v51 = vand.u32 65535, %v305_v48  ;;  %v310_v52 = vshrl.u32 %v305_v48, 16 }
  0xb5   : > { %v334_v57 = vmul.u32 %v332_v54, %v307_v49  ;;  %v335_v58 = vmul.u32 %v331_v53, %v308_v50  ;;  %v333_v62 = vmul.u32 %v331_v53, %v307_v49  ;;  %v336_v2 = vmul.u32 %v332_v54, %v308_v50 }
  0xb6   : > { %v312_v55 = vmul.u32 %v310_v52, %v307_v49  ;;  %v313_v56 = vmul.u32 %v309_v51, %v308_v50  ;;  %v311_v59 = vmul.u32 %v309_v51, %v307_v49  ;;  %v314_v61 = vmul.u32 %v310_v52, %v308_v50 }
  0xb7   : > { %v337_v63 = vshll.u32 %v334_v57, 16  ;;  %v339_v5 = vshll.u32 %v335_v58, 16  ;;  %v338_v21 = vshrl.u32 %v334_v57, 16  ;;  %v340_v27 = vshrl.u32 %v335_v58, 16 }
  0xb8   : > { %v315_v60 = vshll.u32 %v312_v55, 16  ;;  %v317_v0 = vshll.u32 %v313_v56, 16  ;;  %v316_v15 = vshrl.u32 %v312_v55, 16  ;;  %v318_v25 = vshrl.u32 %v313_v56, 16 }
  0xb9   : > { %vm341_vm7 = vc.u32 %v333_v62, %v337_v63  ;;  %v343_v6 = vadd.s32 %v337_v63, %v333_v62 }
  0xba   : > { %vm319_vm6 = vc.u32 %v311_v59, %v315_v60  ;;  %v321_v1 = vadd.s32 %v315_v60, %v311_v59  ;;  %v342_v9 = vsel %vm341_vm7, 1, %v610_v3 }
  0xbb   : > { %v320_v4 = vsel %vm319_vm6, 1, %v610_v3  ;;  %v344_v13 = vadd.s32 %v342_v9, %v336_v2  ;;  %vm345_vm9 = vc.u32 %v343_v6, %v339_v5  ;;  %v347_v30 = vadd.s32 %v343_v6, %v339_v5 }
  0xbc   : > { %v322_v8 = vadd.s32 %v320_v4, %v314_v61  ;;  %vm323_vm8 = vc.u32 %v321_v1, %v317_v0  ;;  %v346_v20 = vsel %vm345_vm9, 1, %v610_v3  ;;  %v243_v2 = vlaneseq }
  0xbd   : > { %v324_v12 = vsel %vm323_vm8, 1, %v610_v3  ;;  %v348_v22 = vadd.s32 %v346_v20, %v344_v13 }
  0xbe   : > { %v326_v17 = vadd.s32 %v324_v12, %v322_v8  ;;  %v244_v9 = vand.u32 127, %v243_v2 }
  0xbf   : > { %v349_v28 = vadd.s32 %v348_v22, %v338_v21 }
  0xc0   : > { %v327_v26 = vadd.s32 %v326_v17, %v316_v15  ;;  %v249_v17 = vand.u32 15, %v244_v9 }
  0xc1   : > { %v350_v19 = vadd.s32 %v349_v28, %v340_v27 }
  0xc2   : > { %v328_v29 = vadd.s32 %v327_v26, %v318_v25  ;;  %vm257_vm1 = vcmp.eq.s32.totalorder %v249_v17, 0 }
  0xc3   : > { %v354_v31 = vadd.s32 1, %v350_v19 }
  0xc4   : > { %vm353_vm10 = vc.u32 %v328_v29, %v347_v30  ;;  %v352_v18 = vadd.s32 %v347_v30, %v328_v29 }
  0xc5   : > { %v355_v33 = vsel %vm353_vm10, %v354_v31, %v350_v19 }
  0xc6   : > { %v356_v34 = vadd.s32 %v355_v33, %v351_v32 }
  0xc8   : > { %v357_v35 = vadd.s32 536870912, %v356_v34 }
  0xca   : > { %v358_v37 = vshrl.u32 %v357_v35, 30 }
  0xcc   : > { %v359_v38 = vshll.u32 %v358_v37, 30  ;;  %v382_v58 = vsub.s32 4, %v358_v37 }
  0xce   : > { %v360_v36 = vsub.s32 %v356_v34, %v359_v38  ;;  %v383_v63 = vsel %vm260_vm13, %v382_v58, %v358_v37 }
  0xcf   : > { %v385_v3 = vsel %vm739_vm14, 0, %v383_v63 }
  0xd0   : > { %vm361_vm11 = vcmp.lt.s32.totalorder %v360_v36, 0  ;;  %v362_v39 = vsub.s32 0, %v360_v36  ;;  %v402_v8 = vadd.s32 3, %v385_v3 }
  0xd2   : > { %v363_v41 = vsel %vm361_vm11, %v362_v39, %v360_v36  ;;  %v403_v15 = vand.u32 3, %v402_v8 }
  0xd3   : > { %v364_v42 = vclz %v363_v41 }
  0xd4   : > { %vm405_vm15 = vcmp.eq.s32.totalorder %v403_v15, 0  ;;  %vm408_vm0 = vcmp.eq.s32.totalorder %v403_v15, 2  ;;  %vm404_vm2 = vcmp.lt.s32.totalorder %v403_v15, 2 }
  0xd5   : > { %v512_v43 = vadd.s32 4294967294, %v364_v42 }
  0xd7   : > { %vm513_vm12 = vcmp.lt.s32.totalorder %v512_v43, 0 }
  0xd8   : > { %v367_v44 = vsel %vm513_vm12, 0, %v512_v43 }
  0xd9   : > { %v368_v45 = vsub.s32 32, %v367_v44  ;;  %v372_v46 = vsub.s32 4294967266, %v367_v44  ;;  %v369_v47 = vshll.u32 %v360_v36, %v367_v44 }
  0xdb   : > { %v370_v48 = vshrl.u32 %v352_v18, %v368_v45  ;;  %v373_v49 = vadd.s32 127, %v372_v46 }
  0xdd   : > { %v371_v40 = vor.u32 %v370_v48, %v369_v47  ;;  %v374_v50 = vshll.u32 %v373_v49, 23 }
  0xdf   : > { %v375_v51 = vor.u32 4788187, %v374_v50  ;;  %v378_v53 = vcvt.s32.f32 %v371_v40 }
  0xe1   : > { %v376_v52 = vand.u32 2147483647, %v375_v51 }
  0xe3   : > { %v379_v54 = vmul.f32 %v378_v53, %v376_v52 }
  0xe5   : > { %v380_v55 = vxor.u32 2147483648, %v379_v54 }
  0xe7   : > { %v381_v57 = vsel %vm260_vm13, %v380_v55, %v379_v54 }
  0xe8   : > { %v384_v59 = vsel %vm739_vm14, %v685_v7, %v381_v57 }
  0xe9   : > { %v386_v60 = vmul.f32 %v384_v59, %v384_v59 }
  0xeb   : > { %v387_v61 = vmul.f32 -0.001358992, %v386_v60  ;;  %v394_v62 = vmul.f32 -0.00019511016, %v386_v60 }
  0xed   : > { %v388_v0 = vadd.f32 0.041655596, %v387_v61  ;;  %v395_v1 = vadd.f32 0.008332121, %v394_v62 }
  0xef   : > { %v389_v11 = vmul.f32 %v388_v0, %v386_v60  ;;  %v396_v4 = vmul.f32 %v395_v1, %v386_v60 }
  0xf1   : > { %v390_v5 = vadd.f32 -0.4999988, %v389_v11  ;;  %v397_v6 = vadd.f32 -0.16666654, %v396_v4 }
  0xf3   : > { %v391_v10 = vmul.f32 %v390_v5, %v386_v60  ;;  %v398_v12 = vmul.f32 %v397_v6, %v386_v60 }
  0xf5   : > { %v392_v13 = vadd.f32 1.0, %v391_v10  ;;  %v399_v14 = vadd.f32 1.0, %v398_v12 }
  0xf7   : > { %v400_v20 = vmul.f32 %v399_v14, %v384_v59  ;;  %v409_v21 = vxor.u32 2147483648, %v392_v13 }
  0xf9   : > { %v406_v22 = vxor.u32 2147483648, %v400_v20  ;;  %v410_v24 = vsel %vm408_vm0, %v409_v21, %v400_v20 }
  0xfb   : > { %v407_v23 = vsel %vm405_vm15, %v392_v13, %v406_v22 }
  0xfc   : > { %v411_v25 = vsel %vm404_vm2, %v407_v23, %v410_v24 }
  0xfd   : > { %v412_v26 = vsel %vm401_vm3, nan, %v411_v25 }
  0xfe   : > { %v413_v27 = vsel %vm257_vm1, %v685_v7, %v412_v26 }
  0xff   : > { %414 = vst [vmem:[#allocation2] sm:$0x1] %v413_v27 }
 0x100 PF:  {}
 0x106   : > { %v415_v28 = vld [vmem:[#allocation2] sm:$0x1] }
 0x107   : > { %416 = vst [vmem:[%s208_s27] sm:$0x1] %v415_v28 }
 0x108 PF: > { %s13_s16 = sadd.s32 1, %s602_s16   ;;  %s776_s12 = smov %s594_s14 }
 0x109   : > { %p10_p8 = scmp.ge.s32.totalorder %s13_s16, 8   ;;  %s777_s13 = smov %s598_s15 }
 0x10a   : > { %s778_s14 = smov %s781_s17  ;;  %s779_s15 = smov %s785_s18 }
 0x10b   :  { %12 = sbr.rel (!%p10_p8) target bundleno = 3 (0x3), region = 66 }

</bundles_post_ra>
